<compile_context>
chip_gen: v5e
topology: v5e:2x2
jax: 0.10.0
libtpu: 0.0.40
codegen_flags: <defaults>
</compile_context>

<pallas_src>
import jax
import jax.numpy as jnp
import numpy as np
from jax.experimental import pallas as pl
from jax.experimental.pallas import tpu as pltpu


def _round_up(x, m):
    return ((x + m - 1) // m) * m


# ------------------------------ fused forward -------------------------------- #
def complex_conv2d(x, w_real, w_imag, *, kernel_size=(3, 3), stride=(1, 1),
                   padding=(1, 2), causal=True, complex_axis=1):
    """Forward of ComplexConv2d.  x: [B, C, H, W] (NCHW), C even.

    w_real, w_imag: [Co_half, Cin_half, KH, KW] (PyTorch OIHW layout).
    Returns [B, 2*Co_half, Ho, Wo].
    """
    assert complex_axis == 1, "only complex_axis=1 supported"
    B, C, H, W = x.shape
    kh, kw = kernel_size
    sh, sw = stride
    ph, pw = padding
    co_half = w_real.shape[0]
    cin_half = C // 2
    assert C == 2 * cin_half
    assert w_real.shape == (co_half, cin_half, kh, kw)
    assert w_imag.shape == (co_half, cin_half, kh, kw)

    x = x.astype(jnp.float32)
    w_real = w_real.astype(jnp.float32)
    w_imag = w_imag.astype(jnp.float32)

    # ---- geometry ------------------------------------------------------------
    pw_l, pw_r = (pw, 0) if (pw != 0 and causal) else (pw, pw)
    W1 = W + pw_l + pw_r            # width after forward() entry padding
    H1 = H + 2 * ph                 # height after the conv's own padding
    Ho = (H1 - kh) // sh + 1
    Wo = (W1 - kw) // sw + 1

    L = H1 * W1                               # dense flattened output length
    lanes_out = _round_up(L, 128)             # lane-dense output tile width
    max_off = (kh - 1) * W1 + (kw - 1)        # largest in-kernel tap shift
    need_in = lanes_out + max_off
    h_extra = max(0, -(-(need_in - L) // W1)) # extra zero rows = halo + lane pad
    lanes_in = (H1 + h_extra) * W1

    # Single fused pad pass (conv height pad + causal width pad + halo rows),
    # then a metadata-only reshape to the flattened [B, C, lanes_in] layout.
    xp = jnp.pad(x, ((0, 0), (0, 0), (ph, ph + h_extra), (pw_l, pw_r)))
    x_flat = xp.reshape(B, C, lanes_in)

    # ---- block-complex weight, tap-major column order -------------------------
    # column k = (i*kw + j)*C + ch, matching the in-kernel patch scratch rows
    # (per tap, all C channels are one contiguous sublane group).
    top = jnp.concatenate([w_real, -w_imag], axis=1)      # real-output rows
    bot = jnp.concatenate([w_imag,  w_real], axis=1)      # imag-output rows
    wb = jnp.concatenate([top, bot], axis=0)              # [2Co, C, kh, kw]
    K2 = kh * kw * C
    K2p = _round_up(K2, 8)                                # sublane multiple (40)
    w_block = jnp.transpose(wb, (0, 2, 3, 1)).reshape(2 * co_half, K2)
    w_block = jnp.pad(w_block, ((0, 0), (0, K2p - K2)))

    # eps folded into a per-channel bias on the real rows:
    #   real = conv(r+eps,wr) - conv(i+eps,wi)
    #        = conv(r,wr) - conv(i,wi) + eps*(sum(wr) - sum(wi))
    # (approximate at padded borders, error ~1e-11; imag rows have no eps term)
    eps = jnp.float32(1e-10)
    bias_real = eps * (jnp.sum(w_real, axis=(1, 2, 3)) -
                       jnp.sum(w_imag, axis=(1, 2, 3)))
    bias = jnp.concatenate(
        [bias_real, jnp.zeros((co_half,), jnp.float32)]).reshape(2 * co_half, 1)

    # per-tap static shifts in the flattened layout
    offsets = [i * W1 + j for i in range(kh) for j in range(kw)]

    # ---- fused kernel ----------------------------------------------------------
    def kernel(x_ref, w_ref, b_ref, o_ref, p_ref):
        # x_ref: [1, C, lanes_in]     raw channels of one batch element
        # w_ref: [2Co, K2p]           block-complex weights (constant over grid)
        # b_ref: [2Co, 1]             eps bias (real rows only)
        # o_ref: [1, 2Co, lanes_out]  lane-dense output
        # p_ref: [K2p, lanes_out]     VMEM patch scratch (fused im2col)
        if K2p > K2:   # zero pad rows so uninitialized VMEM can't poison the dot
            p_ref[K2:K2p, :] = jnp.zeros((K2p - K2, lanes_out), jnp.float32)
        for t, off in enumerate(offsets):        # 9 static shifted copies
            p_ref[t * C:(t + 1) * C, :] = x_ref[0, :, off:off + lanes_out]
        o_ref[0, :, :] = (
            jnp.dot(w_ref[...], p_ref[...], preferred_element_type=jnp.float32)
            + b_ref[...])

    grid = (B,)   # one maximal lane tile per batch; "parallel" => the two v7x
                  # TensorCores split batches evenly when B is even.
    out_flat = pl.pallas_call(
        kernel,
        out_shape=jax.ShapeDtypeStruct((B, 2 * co_half, lanes_out), jnp.float32),
        grid_spec=pltpu.PrefetchScalarGridSpec(
            num_scalar_prefetch=0,
            grid=grid,
            in_specs=[pl.BlockSpec((1, C, lanes_in), lambda b: (b, 0, 0)),
                      pl.BlockSpec((2 * co_half, K2p), lambda b: (0, 0)),
                      pl.BlockSpec((2 * co_half, 1), lambda b: (0, 0))],
            out_specs=pl.BlockSpec((1, 2 * co_half, lanes_out),
                                   lambda b: (b, 0, 0)),
            scratch_shapes=[pltpu.VMEM((K2p, lanes_out), jnp.float32)]),
        compiler_params=pltpu.CompilerParams(
            dimension_semantics=("parallel",)),
    )(x_flat, w_block, bias)

    # Drop the kw-1 garbage columns per row / apply stride.  No transpose and no
    # HBM patch tensor; this is the only post-kernel pass.
    out = out_flat[:, :, :L].reshape(B, 2 * co_half, H1, W1)
    out = out[:, :, 0:H1 - kh + 1:sh, 0:W1 - kw + 1:sw]
    return out


# -------------------------------- reference ----------------------------------- #
def _reference(x, w_real, w_imag, *, kernel_size, stride, padding, causal):
    """Pure-JAX reference mirroring the PyTorch forward exactly."""
    kh, kw = kernel_size
    ph, pw = padding
    x = x.astype(jnp.float32)
    if pw != 0 and causal:
        x = jnp.pad(x, ((0, 0), (0, 0), (0, 0), (pw, 0)))
    else:
        x = jnp.pad(x, ((0, 0), (0, 0), (0, 0), (pw, pw)))
    real, imag = jnp.split(x, 2, axis=1)

    def conv(inp, w):
        return jax.lax.conv_general_dilated(
            inp, w.astype(jnp.float32), window_strides=stride,
            padding=((ph, ph), (0, 0)),
            dimension_numbers=("NCHW", "OIHW", "NCHW"))

    eps = 1e-10
    rr = conv(real + eps, w_real)
    ii = conv(imag + eps, w_imag)
    ri = conv(real, w_imag)
    ir = conv(imag, w_real)
    return jnp.concatenate([rr - ii, ri + ir], axis=1)


# ----------------------------------- main -------------------------------------- #
if __name__ == "__main__":
    # Module config (matches ComplexConv2d(4, 8, (3,3), (1,1), (1,2), causal=True))
    in_channels, out_channels = 4, 8
    kernel_size, stride, padding = (3, 3), (1, 1), (1, 2)
    causal = True
    cin_half, co_half = in_channels // 2, out_channels // 2

    key = jax.random.PRNGKey(0)
    kx, kr, ki = jax.random.split(key, 3)

    B, H, W = 2, 16, 16
    x = jax.random.normal(kx, (B, in_channels, H, W), dtype=jnp.float32)
    # deterministic weight init (std=0.05 normal, like the intended torch init)
    w_real = 0.05 * jax.random.normal(kr, (co_half, cin_half, *kernel_size),
                                      dtype=jnp.float32)
    w_imag = 0.05 * jax.random.normal(ki, (co_half, cin_half, *kernel_size),
                                      dtype=jnp.float32)

    out = complex_conv2d(x, w_real, w_imag, kernel_size=kernel_size,
                         stride=stride, padding=padding, causal=causal)
    out = jax.block_until_ready(out)

    ref = _reference(x, w_real, w_imag, kernel_size=kernel_size, stride=stride,
                     padding=padding, causal=causal)
    np.testing.assert_allclose(np.asarray(out), np.asarray(ref),
                               rtol=1e-5, atol=1e-5)

    Ho = H + 2 * padding[0] - kernel_size[0] + 1
    Wo = W + padding[1] - kernel_size[1] + 1
    assert out.shape == (B, out_channels, Ho, Wo)

    print("KERNEL_OK")
</pallas_src>

<mosaic_0001>
module attributes {stable_mosaic.version = 11 : i64} {
  func.func @kernel(%arg0: i32, %arg1: memref<1x4x432xf32, #tpu.memory_space<vmem>>, %arg2: memref<8x40xf32, #tpu.memory_space<vmem>>, %arg3: memref<8x1xf32, #tpu.memory_space<vmem>>, %arg4: memref<1x8x384xf32, #tpu.memory_space<vmem>>, %arg5: memref<40x384xf32, #tpu.memory_space<vmem>>) attributes {dimension_semantics = [#tpu.dimension_semantics<parallel>], iteration_bounds = array<i64: 2>, scalar_prefetch = 0 : i64, scratch_operands = 1 : i64, tpu.core_type = #tpu.core_type<tc>, window_params = [{transform_indices = @transform_0, window_bounds = array<i64: 1, 4, 432>}, {pipeline_mode = #tpu.pipeline_mode<synchronous>, transform_indices = @transform_1, window_bounds = array<i64: 8, 40>}, {pipeline_mode = #tpu.pipeline_mode<synchronous>, transform_indices = @transform_2, window_bounds = array<i64: 8, 1>}, {transform_indices = @transform_3, window_bounds = array<i64: 1, 8, 384>}]} {
    %cst = arith.constant 0.000000e+00 : f32
    %0 = vector.broadcast %cst : f32 to vector<4x384xf32>
    %c36 = arith.constant 36 : index
    %c0 = arith.constant 0 : index
    %1 = vector.load %arg5[%c36, %c0] : memref<40x384xf32, #tpu.memory_space<vmem>>, vector<4x384xf32>
    tpu.vector_store %arg5[%c36, %c0], %0 {strides = array<i32>} : memref<40x384xf32, #tpu.memory_space<vmem>>, vector<4x384xf32>,
    %c0_0 = arith.constant 0 : index
    %c0_1 = arith.constant 0 : index
    %c0_2 = arith.constant 0 : index
    %2 = vector.load %arg1[%c0_0, %c0_1, %c0_2] : memref<1x4x432xf32, #tpu.memory_space<vmem>>, vector<1x4x384xf32>
    %3 = vector.shape_cast %2 : vector<1x4x384xf32> to vector<4x384xf32>
    %c0_3 = arith.constant 0 : index
    %c0_4 = arith.constant 0 : index
    %4 = vector.load %arg5[%c0_3, %c0_4] : memref<40x384xf32, #tpu.memory_space<vmem>>, vector<4x384xf32>
    tpu.vector_store %arg5[%c0_3, %c0_4], %3 {strides = array<i32>} : memref<40x384xf32, #tpu.memory_space<vmem>>, vector<4x384xf32>,
    %c0_5 = arith.constant 0 : index
    %c0_6 = arith.constant 0 : index
    %c1 = arith.constant 1 : index
    %5 = vector.load %arg1[%c0_5, %c0_6, %c1] : memref<1x4x432xf32, #tpu.memory_space<vmem>>, vector<1x4x384xf32>
    %6 = vector.shape_cast %5 : vector<1x4x384xf32> to vector<4x384xf32>
    %c4 = arith.constant 4 : index
    %c0_7 = arith.constant 0 : index
    %7 = vector.load %arg5[%c4, %c0_7] : memref<40x384xf32, #tpu.memory_space<vmem>>, vector<4x384xf32>
    tpu.vector_store %arg5[%c4, %c0_7], %6 {strides = array<i32>} : memref<40x384xf32, #tpu.memory_space<vmem>>, vector<4x384xf32>,
    %c0_8 = arith.constant 0 : index
    %c0_9 = arith.constant 0 : index
    %c2 = arith.constant 2 : index
    %8 = vector.load %arg1[%c0_8, %c0_9, %c2] : memref<1x4x432xf32, #tpu.memory_space<vmem>>, vector<1x4x384xf32>
    %9 = vector.shape_cast %8 : vector<1x4x384xf32> to vector<4x384xf32>
    %c8 = arith.constant 8 : index
    %c0_10 = arith.constant 0 : index
    %10 = vector.load %arg5[%c8, %c0_10] : memref<40x384xf32, #tpu.memory_space<vmem>>, vector<4x384xf32>
    tpu.vector_store %arg5[%c8, %c0_10], %9 {strides = array<i32>} : memref<40x384xf32, #tpu.memory_space<vmem>>, vector<4x384xf32>,
    %c0_11 = arith.constant 0 : index
    %c0_12 = arith.constant 0 : index
    %c18 = arith.constant 18 : index
    %11 = vector.load %arg1[%c0_11, %c0_12, %c18] : memref<1x4x432xf32, #tpu.memory_space<vmem>>, vector<1x4x384xf32>
    %12 = vector.shape_cast %11 : vector<1x4x384xf32> to vector<4x384xf32>
    %c12 = arith.constant 12 : index
    %c0_13 = arith.constant 0 : index
    %13 = vector.load %arg5[%c12, %c0_13] : memref<40x384xf32, #tpu.memory_space<vmem>>, vector<4x384xf32>
    tpu.vector_store %arg5[%c12, %c0_13], %12 {strides = array<i32>} : memref<40x384xf32, #tpu.memory_space<vmem>>, vector<4x384xf32>,
    %c0_14 = arith.constant 0 : index
    %c0_15 = arith.constant 0 : index
    %c19 = arith.constant 19 : index
    %14 = vector.load %arg1[%c0_14, %c0_15, %c19] : memref<1x4x432xf32, #tpu.memory_space<vmem>>, vector<1x4x384xf32>
    %15 = vector.shape_cast %14 : vector<1x4x384xf32> to vector<4x384xf32>
    %c16 = arith.constant 16 : index
    %c0_16 = arith.constant 0 : index
    %16 = vector.load %arg5[%c16, %c0_16] : memref<40x384xf32, #tpu.memory_space<vmem>>, vector<4x384xf32>
    tpu.vector_store %arg5[%c16, %c0_16], %15 {strides = array<i32>} : memref<40x384xf32, #tpu.memory_space<vmem>>, vector<4x384xf32>,
    %c0_17 = arith.constant 0 : index
    %c0_18 = arith.constant 0 : index
    %c20 = arith.constant 20 : index
    %17 = vector.load %arg1[%c0_17, %c0_18, %c20] : memref<1x4x432xf32, #tpu.memory_space<vmem>>, vector<1x4x384xf32>
    %18 = vector.shape_cast %17 : vector<1x4x384xf32> to vector<4x384xf32>
    %c20_19 = arith.constant 20 : index
    %c0_20 = arith.constant 0 : index
    %19 = vector.load %arg5[%c20_19, %c0_20] : memref<40x384xf32, #tpu.memory_space<vmem>>, vector<4x384xf32>
    tpu.vector_store %arg5[%c20_19, %c0_20], %18 {strides = array<i32>} : memref<40x384xf32, #tpu.memory_space<vmem>>, vector<4x384xf32>,
    %c0_21 = arith.constant 0 : index
    %c0_22 = arith.constant 0 : index
    %c36_23 = arith.constant 36 : index
    %20 = vector.load %arg1[%c0_21, %c0_22, %c36_23] : memref<1x4x432xf32, #tpu.memory_space<vmem>>, vector<1x4x384xf32>
    %21 = vector.shape_cast %20 : vector<1x4x384xf32> to vector<4x384xf32>
    %c24 = arith.constant 24 : index
    %c0_24 = arith.constant 0 : index
    %22 = vector.load %arg5[%c24, %c0_24] : memref<40x384xf32, #tpu.memory_space<vmem>>, vector<4x384xf32>
    tpu.vector_store %arg5[%c24, %c0_24], %21 {strides = array<i32>} : memref<40x384xf32, #tpu.memory_space<vmem>>, vector<4x384xf32>,
    %c0_25 = arith.constant 0 : index
    %c0_26 = arith.constant 0 : index
    %c37 = arith.constant 37 : index
    %23 = vector.load %arg1[%c0_25, %c0_26, %c37] : memref<1x4x432xf32, #tpu.memory_space<vmem>>, vector<1x4x384xf32>
    %24 = vector.shape_cast %23 : vector<1x4x384xf32> to vector<4x384xf32>
    %c28 = arith.constant 28 : index
    %c0_27 = arith.constant 0 : index
    %25 = vector.load %arg5[%c28, %c0_27] : memref<40x384xf32, #tpu.memory_space<vmem>>, vector<4x384xf32>
    tpu.vector_store %arg5[%c28, %c0_27], %24 {strides = array<i32>} : memref<40x384xf32, #tpu.memory_space<vmem>>, vector<4x384xf32>,
    %c0_28 = arith.constant 0 : index
    %c0_29 = arith.constant 0 : index
    %c38 = arith.constant 38 : index
    %26 = vector.load %arg1[%c0_28, %c0_29, %c38] : memref<1x4x432xf32, #tpu.memory_space<vmem>>, vector<1x4x384xf32>
    %27 = vector.shape_cast %26 : vector<1x4x384xf32> to vector<4x384xf32>
    %c32 = arith.constant 32 : index
    %c0_30 = arith.constant 0 : index
    %28 = vector.load %arg5[%c32, %c0_30] : memref<40x384xf32, #tpu.memory_space<vmem>>, vector<4x384xf32>
    tpu.vector_store %arg5[%c32, %c0_30], %27 {strides = array<i32>} : memref<40x384xf32, #tpu.memory_space<vmem>>, vector<4x384xf32>,
    %c0_31 = arith.constant 0 : index
    %c0_32 = arith.constant 0 : index
    %29 = vector.load %arg2[%c0_31, %c0_32] : memref<8x40xf32, #tpu.memory_space<vmem>>, vector<8x40xf32>
    %c0_33 = arith.constant 0 : index
    %c0_34 = arith.constant 0 : index
    %30 = vector.load %arg5[%c0_33, %c0_34] : memref<40x384xf32, #tpu.memory_space<vmem>>, vector<40x384xf32>
    %cst_35 = arith.constant dense<0.000000e+00> : vector<8x384xf32>
    %31 = tpu.matmul %29, %30, %cst_35 {dimension_numbers = #tpu.dot_dimension_numbers<[1], [0], [0], [1], [0, 0, 1, 1], [], []>} : vector<8x40xf32>, vector<40x384xf32>, vector<8x384xf32> -> vector<8x384xf32>
    %c0_36 = arith.constant 0 : index
    %c0_37 = arith.constant 0 : index
    %32 = vector.load %arg3[%c0_36, %c0_37] : memref<8x1xf32, #tpu.memory_space<vmem>>, vector<8x1xf32>
    %33 = vector.broadcast %32 : vector<8x1xf32> to vector<8x384xf32>
    %34 = arith.addf %31, %33 : vector<8x384xf32>
    %c0_38 = arith.constant 0 : index
    %c0_39 = arith.constant 0 : index
    %c0_40 = arith.constant 0 : index
    %35 = vector.load %arg4[%c0_38, %c0_39, %c0_40] : memref<1x8x384xf32, #tpu.memory_space<vmem>>, vector<1x8x384xf32>
    %36 = vector.shape_cast %35 : vector<1x8x384xf32> to vector<8x384xf32>
    %37 = vector.shape_cast %34 : vector<8x384xf32> to vector<1x8x384xf32>
    tpu.vector_store %arg4[%c0_38, %c0_39, %c0_40], %37 {strides = array<i32>} : memref<1x8x384xf32, #tpu.memory_space<vmem>>, vector<1x8x384xf32>,
    return
  }
  func.func @transform_0(%arg0: i32) -> (i32, i32, i32) {
    %c0_i32 = arith.constant 0 : i32
    %c0_i32_0 = arith.constant 0 : i32
    %c0_i32_1 = arith.constant 0 : i32
    return %arg0, %c0_i32, %c0_i32_0 : i32, i32, i32
  }
  func.func @transform_1(%arg0: i32) -> (i32, i32) {
    %c0_i32 = arith.constant 0 : i32
    %c0_i32_0 = arith.constant 0 : i32
    %c0_i32_1 = arith.constant 0 : i32
    return %c0_i32, %c0_i32_0 : i32, i32
  }
  func.func @transform_2(%arg0: i32) -> (i32, i32) {
    %c0_i32 = arith.constant 0 : i32
    %c0_i32_0 = arith.constant 0 : i32
    %c0_i32_1 = arith.constant 0 : i32
    return %c0_i32, %c0_i32_0 : i32, i32
  }
  func.func @transform_3(%arg0: i32) -> (i32, i32, i32) {
    %c0_i32 = arith.constant 0 : i32
    %c0_i32_0 = arith.constant 0 : i32
    %c0_i32_1 = arith.constant 0 : i32
    return %arg0, %c0_i32, %c0_i32_0 : i32, i32, i32
  }
}

</mosaic_0001>

<bundles_post_ra>
// kernel: tpu_custom_call.1
= control target key start
LH: loop header
LB: loop body
LE: loop exit
PB: predicated region body
PF: predicated region fallthrough
CT: control target
= control target key end

     0   :  { %8 = vsyncpa [#allocation4], 0  ;;  %s1008_s0 = inlined_call_operand.hbm [shape: f32[2,4,432], index: 0, kind: input, shape index: {}]   ;;  %s1009_s1 = inlined_call_operand.vmem [shape: f32[8,40], index: 1, kind: input, shape index: {}]   ;;  %s1010_s2 = inlined_call_operand.vmem [shape: f32[8,1], index: 2, kind: input, shape index: {}]   ;;  %s1011_s3 = inlined_call_operand.hbm [shape: f32[2,8,384], index: 3, kind: output, shape index: {}]  }
   0x1   :  { %10 = vsyncpa [#allocation4 + $0x1], 0 }
   0x2   :  { %11 = vsyncpa [#allocation5], 0 }
   0x3   :  { %13 = vsyncpa [#allocation5 + $0x1], 0  ;;  %s823_s12 = smov 0   ;;  %s825_s13 = smov 0  }
   0x4   :  { %s827_s14 = smov 0   ;;  %s829_s15 = smov 0  }
   0x5 LB: > { %s844_s16 = sadd.s32 4294967295, %s791_s15   ;;  %s620_s17 = sadd.s32 4294967294, %s791_s15   ;;  %s791_s15 = sphi %s829_s15, %s1021_s15   ;;  %s787_s14 = sphi %s827_s14, %s1020_s14   ;;  %s783_s13 = sphi %s825_s13, %s1019_s13   ;;  %s779_s12 = sphi %s823_s12, %s1018_s12  }
   0x6   : > { %s848_s18 = sadd.s32 1, %s791_s15   ;;  %s26_s19 = sadd.s32 1, %s787_s14 }
   0x7   : > { %s23_s20 = ssub.s32 %s791_s15, %s848_s18  ;;  %p33_p0 = scmp.ne.s32.totalorder %s787_s14, %s783_s13 }
   0x8   : > { %p24_p1 = scmp.eq.s32.totalorder %s23_s20, 0  ;;  %p34_p2 = scmp.eq.s32.totalorder %s791_s15, 0 }
   0x9   : > { %p39_p3 = scmp.ne.s32.totalorder %s783_s13, %s779_s12  ;;  %p40_p4 = scmp.eq.s32.totalorder %s844_s16, 0 }
   0xa   : > { %s860_s21 = scalar_select %p24_p1, %s787_s14, %s26_s19  }
   0xb   : > { %p862_p5 = por %p34_p2, %p33_p0  ;;  %p866_p6 = por %p40_p4, %p39_p3 }
   0xc   : > { %p105_p7 = scmp.eq.s32.totalorder %s844_s16, 1  ;;  %p111_p8 = scmp.eq.s32.totalorder %s620_s17, 1 }
   0xd   : > { %p649_p10 = scmp.lt.s32.totalorder %s791_s15, 2  ;;  %s137_s26 = sand.u32 1, %s787_s14  }
   0xe   : > { %p873_p11 = por %p105_p7, %p33_p0  ;;  %p877_p12 = por %p111_p8, %p39_p3 }
   0xf   : > { %s634_s27 = sshll.u32 %s791_s15, 4  ;;  %s623_s28 = sshll.u32 %s137_s26, 4 }
  0x10   : > { %s146_s4 = scalar_lea.hbm %s1008_s0, %s634_s27  ;;  %s141_s6 = scalar_lea.vmem [#allocation3], %s623_s28 }
  0x11   : > { %s148_s5 = sshll.u32 %s146_s4, 4  ;;  %s150_s7 = sshll.u32 %s141_s6, 4  ;;  %s149_s5 = int_to_ptr.hbm [resolvable:$true] %s148_s5  ;;  %s151_s7 = int_to_ptr.vmem [resolvable:$true] %s150_s7 }
  0x12   : > { %p888_p13 = pnand %p649_p10, %p862_p5  ;;  %p626_p0 = scmp.ge.s32.totalorder %s791_s15, 1 }
  0x13   : > { %p155_p1 = scmp.lt.s32.totalorder %s791_s15, 3  ;;  %s138_s9 = scalar_lea.sflag [#allocation4], %s137_s26 }
  0x14   : > { %s695_s10 = sshra.s32 %s149_s5, 4  ;;  %p699_p3 = pneg %p888_p13  ;;  %s696_s10 = int_to_ptr.hbm [resolvable:$true] %s695_s10 }
  0x15   : > { %s697_s11 = scalar_lea.hbm %s696_s10, 16  ;;  %s702_s20 = scalar_lea.hbm %s1008_s0, 32 }
  0x16   : > { %p698_p2 = scmp.ne.s32.totalorder %s696_s10, %s697_s11  ;;  %p703_p5 = scmp.lt.s32.totalorder %s696_s10, %s1008_s0 }
  0x17   : > { %p704_p8 = scmp.lt.s32.totalorder %s702_s20, %s697_s11 }
  0x18   : > { %p700_p4 = pnand %p699_p3, %p698_p2 }
  0x19   : > { %p705_p10 = por %p704_p8, %p703_p5 }
  0x1a   : > { %p701_p7 = pneg %p700_p4 }
  0x1c   : > { %p706_p9 = pnand %p705_p10, %p701_p7 }
  0x1e   : > { %709 = shalt.err (!%p706_p9)
}
  0x1f   : > { %644 = dma.hbm_to_vmem [thread:$0]  (!%p888_p13), %s149_s5, 256, %s151_s7, %s138_s9  }
  0x20   : > { %p156_p2 = pnand %p626_p0, %p155_p1 }
  0x21   : > { %s909_s26 = sand.u32 (!%p156_p2), 1, %s783_s13  }
  0x22   : > { %159 = sbr.rel (%p156_p2) target bundleno = 404 (0x194), region = 32  ;;  %s627_s28 = sshll.u32 (!%p156_p2), %s909_s26, 4 }
  0x23   : > { %s162_s29 = scalar_lea.sflag (!%p156_p2), [#allocation4], %s909_s26  ;;  %s165_s30 = scalar_lea.vmem (!%p156_p2), [#allocation3], %s627_s28 }
  0x27   : > { %770 = dma.done.wait (%p866_p6), %s162_s29, 256  }
  0x28   : > { %772 = vsyncadd (%p866_p6), %s162_s29, 4294967040  ;;  %v193_v0 = vld [vmem:[%s165_s30 + $0x8] sm:$0xf]  ;;  %v917_v1 = vld [vmem:[%s165_s30] sm:$0xff]  ;;  %s793_s23 = smov 127   ;;  %s794_s4 = smov 126  }
  0x29   : > { %198 = vst [vmem:[#allocation1 + $0x10] ss:$2 sm:$0xff] %v193_v0  ;;  %v920_v2 = vld [vmem:[%s165_s30 + $0x8] sm:$0xff]  ;;  %s795_s5 = smov 110   ;;  %s796_s6 = smov 109   ;;  %vm228_vm0 = vcmask 1039360  }
  0x2a   : > { %196 = vst [vmem:[#allocation1] ss:$2 sm:$0xff] %v917_v1  ;;  %s797_s7 = smov 108   ;;  %s798_s8 = smov 91   ;;  %vm257_vm1 = vcmask 1031168   ;;  %vm287_vm2 = vcmask 900096  }
  0x2b   : > { %s799_s9 = smov 92   ;;  %s800_s10 = smov 90   ;;  %vm316_vm3 = vcmask 891904   ;;  %vm405_vm4 = vcmask 744448   ;;  %vm346_vm5 = vcmask 883712   ;;  %vm375_vm6 = vcmask 752640  }
  0x2c   : > { %vm434_vm7 = vcmask 736256   ;;  %vm466_vm8 = vcmask 326656   ;;  %s635_s22 = smul.u32 24, %s909_s26 }
  0x2d   : > { %s636_s27 = smul.u32 24, %s844_s16  ;;  %s534_s16 = scalar_lea.sflag [#allocation5], %s909_s26 }
  0x2f   : > { %s545_s30 = scalar_lea.hbm %s1011_s3, %s636_s27 }
  0x30   : > { %v201_v3 = vld.sshfl [vmem:[#allocation1 + $0x10] sm:$0xff pattern:$0x75316420] }
  0x31   : > { %215 = vst [vmem:[#allocation1 + $0x11] ss:$2 sm:$0xff] %v920_v2  ;;  %v199_v4 = vld.sshfl [vmem:[#allocation1] sm:$0xff pattern:$0x75316420] }
  0x32   : > { %207 = vst [vmem:[#allocation2 + $0x50] sm:$0xf] %v201_v3  ;;  %v200_v5 = vld.sshfl [vmem:[#allocation1 + $0x8] sm:$0xff pattern:$0x75316420] }
  0x33   : > { %213 = vst [vmem:[#allocation1 + $0x1] ss:$2 sm:$0xff] %v917_v1 }
  0x34   : > { %205 = vst [vmem:[#allocation2] sm:$0xf] %v199_v4 }
  0x35   : > { %206 = vst [vmem:[#allocation2 + $0x38] sm:$0xf] %v200_v5  ;;  %v801_v5 = vmov 0.0  }
  0x36   : > { %191 = vst [vmem:[#allocation2 + $0x40] sm:$0xf0] %v801_v5 }
  0x37   : > { %189 = vst [vmem:[#allocation2 + $0x18] sm:$0xf0] %v801_v5 }
  0x38   : > { %v218_v6 = vld.sshfl [vmem:[#allocation1 + $0x10] sm:$0xff pattern:$0x75316420]  ;;  %v219_v7 = vld.sshfl [vmem:[#allocation1 + $0x18] sm:$0xff pattern:$0x75316420] }
  0x39   : > { %224 = vrot.lane.b32.xlu1 %v218_v6, %s793_s23  ;;  %226 = vrot.lane.b32.xlu2 %v219_v7, %s793_s23  ;;  %244 = vst [vmem:[#allocation1 + $0x10] ss:$2 sm:$0xff] %v920_v2 }
  0x3a   : > { %v927_v8 = vld.sshfl [vmem:[#allocation1] sm:$0xff pattern:$0x75316420]  ;;  %v929_v9 = vld.sshfl [vmem:[#allocation1 + $0x8] sm:$0xff pattern:$0x75316420] }
  0x3b   : > { %242 = vst [vmem:[#allocation1] ss:$2 sm:$0xff] %v917_v1 }
  0x3c   : > { %190 = vst [vmem:[#allocation2 + $0x60] sm:$0xf0] %v801_v5 }
  0x40   : > { %v247_v10 = vld.sshfl [vmem:[#allocation1 + $0x10] sm:$0xff pattern:$0x75316420]  ;;  %v248_v11 = vld.sshfl [vmem:[#allocation1 + $0x18] sm:$0xff pattern:$0x75316420] }
  0x41   : > { %253 = vrot.lane.b32.xlu1 %v247_v10, %s794_s4  ;;  %255 = vrot.lane.b32.xlu2 %v248_v11, %s794_s4  ;;  %274 = vst [vmem:[#allocation1 + $0x11] ss:$2 sm:$0xff] %v920_v2 }
  0x42   : > { %v246_v12 = vld.sshfl [vmem:[#allocation1 + $0x8] sm:$0xff pattern:$0x75316420]  ;;  %v245_v13 = vld.sshfl [vmem:[#allocation1] sm:$0xff pattern:$0x75316420] }
  0x43   : > { %251 = vrot.lane.b32.xlu0 %v246_v12, %s794_s4  ;;  %272 = vst [vmem:[#allocation1 + $0x1] ss:$2 sm:$0xff] %v917_v1 }
  0x48   : > { %v278_v14 = vld.sshfl [vmem:[#allocation1 + $0x18] sm:$0xff pattern:$0x75316420]  ;;  %v277_v15 = vld.sshfl [vmem:[#allocation1 + $0x10] sm:$0xff pattern:$0x75316420] }
  0x49   : > { %285 = vrot.lane.b32.xlu1 %v278_v14, %s795_s5  ;;  %303 = vst [vmem:[#allocation1 + $0x10] ss:$2 sm:$0xff] %v920_v2  ;;  %249 = vrot.lane.b32.xlu2 %v245_v13, %s794_s4 }
  0x4a   : > { %v275_v16 = vld.sshfl [vmem:[#allocation1] sm:$0xff pattern:$0x75316420]  ;;  %v276_v17 = vld.sshfl [vmem:[#allocation1 + $0x8] sm:$0xff pattern:$0x75316420] }
  0x4b   : > { %283 = vrot.lane.b32.xlu0 %v277_v15, %s795_s5  ;;  %301 = vst [vmem:[#allocation1] ss:$2 sm:$0xff] %v917_v1 }
  0x50   : > { %v307_v18 = vld.sshfl [vmem:[#allocation1 + $0x18] sm:$0xff pattern:$0x75316420]  ;;  %v306_v19 = vld.sshfl [vmem:[#allocation1 + $0x10] sm:$0xff pattern:$0x75316420] }
  0x51   : > { %314 = vrot.lane.b32.xlu1 %v307_v18, %s796_s6  ;;  %333 = vst [vmem:[#allocation1 + $0x11] ss:$2 sm:$0xff] %v920_v2 }
  0x52   : > { %v305_v20 = vld.sshfl [vmem:[#allocation1 + $0x8] sm:$0xff pattern:$0x75316420]  ;;  %v304_v21 = vld.sshfl [vmem:[#allocation1] sm:$0xff pattern:$0x75316420] }
  0x53   : > { %312 = vrot.lane.b32.xlu0 %v306_v19, %s796_s6  ;;  %310 = vrot.lane.b32.xlu2 %v305_v20, %s796_s6  ;;  %331 = vst [vmem:[#allocation1 + $0x1] ss:$2 sm:$0xff] %v917_v1  ;;  %v460_v20 = vld [vmem:[%s1010_s2] sm:$0xff] }
  0x58   : > { %v337_v22 = vld.sshfl [vmem:[#allocation1 + $0x18] sm:$0xff pattern:$0x75316420]  ;;  %v336_v23 = vld.sshfl [vmem:[#allocation1 + $0x10] sm:$0xff pattern:$0x75316420] }
  0x59   : > { %308 = vrot.lane.b32.xlu1 %v304_v21, %s796_s6  ;;  %362 = vst [vmem:[#allocation1 + $0x10] ss:$2 sm:$0xff] %v920_v2  ;;  %v802_v21 = vmov 0  }
  0x5a   : > { %v335_v24 = vld.sshfl [vmem:[#allocation1 + $0x8] sm:$0xff pattern:$0x75316420]  ;;  %v334_v25 = vld.sshfl [vmem:[#allocation1] sm:$0xff pattern:$0x75316420]  ;;  %693 = vset.pattern.permute.xlu2 %v802_v21  ;;  %694 = vset.pattern.permute.xlu0 %v802_v21 }
  0x5b   : > { %344 = vrot.lane.b32.xlu0 %v337_v22, %s797_s7  ;;  %342 = vrot.lane.b32.xlu2 %v336_v23, %s797_s7  ;;  %360 = vst [vmem:[#allocation1] ss:$2 sm:$0xff] %v917_v1 }
  0x60   : > { %v365_v26 = vld.sshfl [vmem:[#allocation1 + $0x10] sm:$0xff pattern:$0x75316420]  ;;  %v366_v27 = vld.sshfl [vmem:[#allocation1 + $0x18] sm:$0xff pattern:$0x75316420] }
  0x61   : > { %340 = vrot.lane.b32.xlu1 %v335_v24, %s797_s7  ;;  %392 = vst [vmem:[#allocation1 + $0x11] ss:$2 sm:$0xff] %v920_v2 }
  0x62   : > { %v364_v28 = vld.sshfl [vmem:[#allocation1 + $0x8] sm:$0xff pattern:$0x75316420]  ;;  %v363_v29 = vld.sshfl [vmem:[#allocation1] sm:$0xff pattern:$0x75316420] }
  0x63   : > { %338 = vrot.lane.b32.xlu0 %v334_v25, %s797_s7  ;;  %390 = vst [vmem:[#allocation1 + $0x1] ss:$2 sm:$0xff] %v917_v1 }
  0x68   : > { %v395_v30 = vld.sshfl [vmem:[#allocation1 + $0x10] sm:$0xff pattern:$0x75316420]  ;;  %v396_v31 = vld.sshfl [vmem:[#allocation1 + $0x18] sm:$0xff pattern:$0x75316420] }
  0x69   : > { %401 = vrot.lane.b32.xlu2 %v395_v30, %s798_s8  ;;  %371 = vrot.lane.b32.xlu1 %v365_v26, %s799_s9  ;;  %421 = vst [vmem:[#allocation1 + $0x10] ss:$2 sm:$0xff] %v920_v2 }
  0x6a   : > { %v394_v32 = vld.sshfl [vmem:[#allocation1 + $0x8] sm:$0xff pattern:$0x75316420]  ;;  %v393_v33 = vld.sshfl [vmem:[#allocation1] sm:$0xff pattern:$0x75316420] }
  0x6b   : > { %367 = vrot.lane.b32.xlu0 %v363_v29, %s799_s9  ;;  %419 = vst [vmem:[#allocation1] ss:$2 sm:$0xff] %v917_v1 }
  0x70   : > { %v424_v34 = vld.sshfl [vmem:[#allocation1 + $0x10] sm:$0xff pattern:$0x75316420]  ;;  %v425_v36 = vld.sshfl [vmem:[#allocation1 + $0x18] sm:$0xff pattern:$0x75316420] }
  0x71   : > { %403 = vrot.lane.b32.xlu2 %v396_v31, %s798_s8  ;;  %373 = vrot.lane.b32.xlu1 %v366_v27, %s799_s9 }
  0x72   : > { %v422_v35 = vld.sshfl [vmem:[#allocation1] sm:$0xff pattern:$0x75316420]  ;;  %v423_v37 = vld.sshfl [vmem:[#allocation1 + $0x8] sm:$0xff pattern:$0x75316420] }
  0x73   : > { %399 = vrot.lane.b32.xlu0 %v394_v32, %s798_s8 }
  0x79   : > { %369 = vrot.lane.b32.xlu1 %v364_v28, %s799_s9  ;;  %397 = vrot.lane.b32.xlu2 %v393_v33, %s798_s8 }
  0x7b   : > { %430 = vrot.lane.b32.xlu0 %v424_v34, %s800_s10 }
  0x81   : > { %279 = vrot.lane.b32.xlu1 %v275_v16, %s795_s5  ;;  %426 = vrot.lane.b32.xlu2 %v422_v35, %s800_s10 }
  0x83   : > { %432 = vrot.lane.b32.xlu0 %v425_v36, %s800_s10  ;;  %v444_v36 = vld [vmem:[%s1009_s1] sm:$0xff] }
  0x89   : > { %222 = vrot.lane.b32.xlu1 %v929_v9, %s793_s23  ;;  %281 = vrot.lane.b32.xlu2 %v276_v17, %s795_s5  ;;  %s549_s5 = sshll.u32 %s545_s30, 4  ;;  %s550_s5 = int_to_ptr.hbm [resolvable:$true] %s549_s5 }
  0x8a   : > { %s739_s6 = sshra.s32 %s550_s5, 4  ;;  %s740_s6 = int_to_ptr.hbm [resolvable:$true] %s739_s6 }
  0x8b   : > { %428 = vrot.lane.b32.xlu0 %v423_v37, %s800_s10  ;;  %s741_s7 = scalar_lea.hbm %s740_s6, 24  ;;  %s745_s10 = scalar_lea.hbm %s1011_s3, 48 }
  0x8c   : > { %p742_p6 = scmp.ne.s32.totalorder %s740_s6, %s741_s7  ;;  %p746_p0 = scmp.lt.s32.totalorder %s740_s6, %s1011_s3 }
  0x8d   : > { %p747_p1 = scmp.lt.s32.totalorder %s745_s10, %s741_s7 }
  0x8e   : > { %p743_p9 = pnand %p742_p6, %p873_p11 }
  0x8f   : > { %p748_p3 = por %p747_p1, %p746_p0 }
  0x90   : > { %p744_p13 = pneg %p743_p9 }
  0x91   : > { %463 = vperm.xlu2 %693, %v460_v20  }
  0x92   : > { %p749_p4 = pnand %p748_p3, %p744_p13 }
  0x93   : > { %220 = vrot.lane.b32.xlu0 %v927_v8, %s793_s23  ;;  %v227_v38 = vpop.permute.xlu2 %226  ;;  %s188_s23 = scalar_lea.vmem [#allocation6], %s635_s22 }
  0x94   : > { %s547_s4 = sshll.u32 %s188_s23, 4  ;;  %s548_s4 = int_to_ptr.vmem [resolvable:$true] %s547_s4 }
  0x9b   : > { %v256_v39 = vpop.permute.xlu2 %255 }
  0xa3   : > { %v250_v40 = vpop.permute.xlu2 %249 }
  0xab   : > { %v952_v41 = vpop.permute.xlu1 %224 }
  0xac   : > { %v231_v42 = vsel %vm228_vm0, %v952_v41, %v227_v38 }
  0xad   : > { %237 = vst [vmem:[#allocation2 + $0x50] sm:$0xf0] %v231_v42  ;;  %v311_v43 = vpop.permute.xlu2 %310 }
  0xb3   : > { %v254_v44 = vpop.permute.xlu1 %253 }
  0xb4   : > { %v260_v45 = vsel %vm257_vm1, %v254_v44, %v256_v39  ;;  %v447_v39 = vld [vmem:[#allocation2 + $0x50] sm:$0xff] }
  0xb5   : > { %266 = vst [vmem:[#allocation2 + $0x28] sm:$0xf] %v260_v45  ;;  %v252_v46 = vpop.permute.xlu0 %251  ;;  %v343_v49 = vpop.permute.xlu2 %342 }
  0xb6   : > { %v258_v47 = vsel %vm257_vm1, %v250_v40, %v252_v46  ;;  %v259_v48 = vsel %vm257_vm1, %v252_v46, %v254_v44 }
  0xb7   : > { %264 = vst [vmem:[#allocation2 + $0x68] sm:$0xf] %v258_v47 }
  0xb8   : > { %265 = vst [vmem:[#allocation2 + $0x30] sm:$0xf] %v259_v48 }
  0xbb   : > { %v286_v50 = vpop.permute.xlu1 %285 }
  0xbd   : > { %v284_v51 = vpop.permute.xlu0 %283 }
  0xbe   : > { %v290_v52 = vsel %vm287_vm2, %v284_v51, %v286_v50 }
  0xbf   : > { %296 = vst [vmem:[#allocation2 + $0x28] sm:$0xf0] %v290_v52 }
  0xc3   : > { %v315_v53 = vpop.permute.xlu1 %314  ;;  %v402_v54 = vpop.permute.xlu2 %401 }
  0xc5   : > { %v313_v55 = vpop.permute.xlu0 %312 }
  0xc6   : > { %v318_v56 = vsel %vm316_vm3, %v311_v43, %v313_v55  ;;  %v319_v57 = vsel %vm316_vm3, %v313_v55, %v315_v53  ;;  %v450_v34 = vld [vmem:[#allocation2 + $0x28] sm:$0xff] }
  0xc7   : > { %324 = vst [vmem:[#allocation2 + $0x70] sm:$0xf] %v318_v56 }
  0xc8   : > { %325 = vst [vmem:[#allocation2 + $0x20] sm:$0xf] %v319_v57 }
  0xcb   : > { %v404_v58 = vpop.permute.xlu2 %403  ;;  %v309_v59 = vpop.permute.xlu1 %308 }
  0xcc   : > { %v408_v60 = vsel %vm405_vm4, %v402_v54, %v404_v58  ;;  %v317_v61 = vsel %vm316_vm3, %v309_v59, %v311_v43 }
  0xcd   : > { %v345_v62 = vpop.permute.xlu0 %344  ;;  %414 = vst [vmem:[#allocation2 + $0x10] sm:$0xf0] %v408_v60 }
  0xce   : > { %v349_v63 = vsel %vm346_vm5, %v343_v49, %v345_v62  ;;  %323 = vst [vmem:[#allocation2 + $0x8] sm:$0xf] %v317_v61 }
  0xcf   : > { %355 = vst [vmem:[#allocation2 + $0x20] sm:$0xf0] %v349_v63 }
  0xd3   : > { %v341_v0 = vpop.permute.xlu1 %340  ;;  %v398_v1 = vpop.permute.xlu2 %397 }
  0xd4   : > { %v348_v2 = vsel %vm346_vm5, %v341_v0, %v343_v49 }
  0xd5   : > { %354 = vst [vmem:[#allocation2 + $0x70] sm:$0xf0] %v348_v2  ;;  %v339_v3 = vpop.permute.xlu0 %338 }
  0xd6   : > { %v347_v4 = vsel %vm346_vm5, %v339_v3, %v341_v0  ;;  %v453_v33 = vld [vmem:[#allocation2 + $0x20] sm:$0xff] }
  0xd7   : > { %353 = vst [vmem:[#allocation2 + $0x8] sm:$0xf0] %v347_v4 }
  0xdb   : > { %v372_v6 = vpop.permute.xlu1 %371  ;;  %v427_v7 = vpop.permute.xlu2 %426 }
  0xdc   : > { %v452_v44 = vld [vmem:[#allocation2 + $0x70] sm:$0xff] }
  0xdd   : > { %v368_v8 = vpop.permute.xlu0 %367 }
  0xde   : > { %v451_v43 = vld [vmem:[#allocation2 + $0x8] sm:$0xff] }
  0xe3   : > { %v374_v9 = vpop.permute.xlu1 %373  ;;  %v282_v10 = vpop.permute.xlu2 %281 }
  0xe4   : > { %v378_v11 = vsel %vm375_vm6, %v372_v6, %v374_v9  ;;  %v289_v12 = vsel %vm287_vm2, %v282_v10, %v284_v51 }
  0xe5   : > { %384 = vst [vmem:[#allocation2 + $0x10] sm:$0xf] %v378_v11  ;;  %v400_v13 = vpop.permute.xlu0 %399 }
  0xe6   : > { %v406_v14 = vsel %vm405_vm4, %v398_v1, %v400_v13  ;;  %v407_v15 = vsel %vm405_vm4, %v400_v13, %v402_v54  ;;  %295 = vst [vmem:[#allocation2 + $0x30] sm:$0xf0] %v289_v12 }
  0xe7   : > { %412 = vst [vmem:[#allocation2 + $0x48] sm:$0xf0] %v406_v14 }
  0xe8   : > { %413 = vst [vmem:[#allocation2 + $0x58] sm:$0xf0] %v407_v15 }
  0xeb   : > { %v370_v16 = vpop.permute.xlu1 %369  ;;  %v464_v49 = vpop.permute.xlu2 %463 }
  0xec   : > { %v376_v17 = vsel %vm375_vm6, %v368_v8, %v370_v16  ;;  %v377_v18 = vsel %vm375_vm6, %v370_v16, %v372_v6  ;;  %v456_v32 = vld [vmem:[#allocation2 + $0x10] sm:$0xff] }
  0xed   : > { %382 = vst [vmem:[#allocation2 + $0x48] sm:$0xf] %v376_v17  ;;  %v431_v19 = vpop.permute.xlu0 %430  ;;  %v449_v46 = vld [vmem:[#allocation2 + $0x30] sm:$0xff] }
  0xee   : > { %383 = vst [vmem:[#allocation2 + $0x58] sm:$0xf] %v377_v18 }
  0xf3   : > { %v280_v22 = vpop.permute.xlu1 %279 }
  0xf4   : > { %v288_v23 = vsel %vm287_vm2, %v280_v22, %v282_v10 }
  0xf5   : > { %294 = vst [vmem:[#allocation2 + $0x68] sm:$0xf0] %v288_v23  ;;  %v433_v24 = vpop.permute.xlu0 %432  ;;  %v455_v42 = vld [vmem:[#allocation2 + $0x58] sm:$0xff] }
  0xf6   : > { %v437_v25 = vsel %vm434_vm7, %v431_v19, %v433_v24 }
  0xf7   : > { %443 = vst [vmem:[#allocation2 + $0x40] sm:$0xf] %v437_v25 }
  0xfb   : > { %v223_v26 = vpop.permute.xlu1 %222 }
  0xfc   : > { %v230_v27 = vsel %vm228_vm0, %v223_v26, %v952_v41  ;;  %v454_v41 = vld [vmem:[#allocation2 + $0x48] sm:$0xff] }
  0xfd   : > { %236 = vst [vmem:[#allocation2 + $0x38] sm:$0xf0] %v230_v27  ;;  %v429_v28 = vpop.permute.xlu0 %428  ;;  %v448_v45 = vld [vmem:[#allocation2 + $0x68] sm:$0xff] }
  0xfe   : > { %v435_v29 = vsel %vm434_vm7, %v427_v7, %v429_v28  ;;  %v436_v30 = vsel %vm434_vm7, %v429_v28, %v431_v19  ;;  %v459_v31 = vld [vmem:[#allocation2 + $0x40] sm:$0xff] }
  0xff   : > { %441 = vst [vmem:[#allocation2 + $0x18] sm:$0xf] %v435_v29  ;;  %521 = vmatpush.msra.mxu2 %v459_v31 }
 0x100   : > { %442 = vst [vmem:[#allocation2 + $0x60] sm:$0xf] %v436_v30 }
 0x101   : > { %522 = vmatpush.msra.mxu2 %v456_v32 }
 0x103   : > { %523 = vmatpush.msra.mxu2 %v453_v33 }
 0x104   : > { %v446_v48 = vld [vmem:[#allocation2 + $0x38] sm:$0xff] }
 0x105   : > { %v221_v35 = vpop.permute.xlu0 %220  ;;  %524 = vmatpush.msra.mxu2 %v450_v34 }
 0x106   : > { %v229_v37 = vsel %vm228_vm0, %v221_v35, %v223_v26  ;;  %v457_v38 = vld [vmem:[#allocation2 + $0x18] sm:$0xff] }
 0x107   : > { %235 = vst [vmem:[#allocation2] sm:$0xf0] %v229_v37  ;;  %481 = vmatpush.msra.mxu0 %v457_v38  ;;  %v458_v40 = vld [vmem:[#allocation2 + $0x60] sm:$0xff]  ;;  %525 = vmatpush.msra.mxu2 %v447_v39 }
 0x108   : > { %501 = vmatpush.msra.mxu1 %v458_v40  ;;  %630 = vmatmul.msk.f32.vlgmr.msra.gmra.mxu2 %vm466_vm8, %v444_v36 }
 0x109   : > { %482 = vmatpush.msra.mxu0 %v454_v41 }
 0x10a   : > { %502 = vmatpush.msra.mxu1 %v455_v42 }
 0x10b   : > { %483 = vmatpush.msra.mxu0 %v451_v43 }
 0x10c   : > { %503 = vmatpush.msra.mxu1 %v452_v44 }
 0x10d   : > { %484 = vmatpush.msra.mxu0 %v448_v45 }
 0x10e   : > { %504 = vmatpush.msra.mxu1 %v449_v46  ;;  %v445_v47 = vld [vmem:[#allocation2] sm:$0xff] }
 0x10f   : > { %485 = vmatpush.msra.mxu0 %v445_v47 }
 0x110   : > { %505 = vmatpush.msra.mxu1 %v446_v48  ;;  %628 = vmatmul.msk.f32.vlgmr.msra.gmra.mxu0 %vm466_vm8, %v444_v36 }
 0x111   : > { %629 = vmatmul.msk.f32.vlgmr.msra.gmra.mxu1 %vm466_vm8, %v444_v36 }
 0x18b   : > { %v527_v50 = vpop.f32.mrf.mxu2 }
 0x18c   : > { %v528_v51 = vadd.f32 %v527_v50, %v464_v49 }
 0x18d   : > { %v487_v52 = vpop.f32.mrf.mxu0 }
 0x18e   : > { %v488_v53 = vadd.f32 %v487_v52, %v464_v49  ;;  %v507_v54 = vpop.f32.mrf.mxu1  ;;  %532 = vst [vmem:[%s188_s23 + $0x10] sm:$0xff] %v528_v51 }
 0x18f   : > { %v508_v55 = vadd.f32 %v507_v54, %v464_v49 }
 0x190   : > { %530 = vst [vmem:[%s188_s23] sm:$0xff] %v488_v53 }
 0x191   : > { %531 = vst [vmem:[%s188_s23 + $0x8] sm:$0xff] %v508_v55 }
 0x192   : > { %752 = shalt.err (!%p749_p4)
}
 0x193   : > { %639 = dma.vmem_to_hbm [thread:$0]  (%p873_p11), %s548_s4, 384, %s550_s5, %s534_s16  }
 0x194 PF: > { %s561_s26 = sand.u32 1, %s779_s12   ;;  %p1017_p7 = scmp.ge.s32.totalorder %s791_s15, 2 }
 0x195   : > { %s562_s19 = scalar_lea.sflag [#allocation5], %s561_s26 }
 0x196   : > { %p646_p5 = pnand %p1017_p7, %p877_p12 }
 0x198   : > { %p647_p8 = pneg %p646_p5 }
 0x19a   : > { %774 = dma.done.wait (%p647_p8), %s562_s19, 384  }
 0x19b   : > { %776 = vsyncadd (%p647_p8), %s562_s19, 4294966912  ;;  %p16_p10 = scmp.ge.s32.totalorder %s848_s18, 4   ;;  %s1018_s12 = smov %s783_s13 }
 0x19c   : > { %s1019_s13 = smov %s787_s14  ;;  %s1020_s14 = smov %s860_s21 }
 0x19d   : > { %s1021_s15 = smov %s848_s18  ;;  %18 = sbr.rel (!%p16_p10) target bundleno = 5 (0x5), region = 90 }
 0x1a2   :  { %568 = vsyncpa [#allocation4], 1 }
 0x1a3   :  { %570 = vsyncpa [#allocation4 + $0x1], 1 }
 0x1a4   :  { %571 = vsyncpa [#allocation5], 1 }
 0x1a5   :  { %573 = vsyncpa [#allocation5 + $0x1], 1 }

</bundles_post_ra>
